<compile_context>
chip_gen: v6e
topology: v6e:2x2x1
jax: 0.10.0
libtpu: 0.0.40
codegen_flags: <defaults>
</compile_context>

<pallas_src>
import functools

import jax
import jax.numpy as jnp
from jax.experimental import pallas as pl
from jax.experimental.pallas import tpu as pltpu

_LANE = 128     # lane-dense padded width for every hidden/output dim
_K_PAD = 896    # 784 padded up to 7 * 128 (aligned contraction dim)
_IN = 784
_OUT = 10
_MAX_TB = 512   # batch tile cap (sweet spot per tile sweeps; >=2 steps at big B)


def _fused_mlp_kernel(x_ref, w1_ref, wrest_ref, b_ref, o_ref):
    """Four chained MXU matmuls on lane-dense (128-wide) tiles.

    x_ref:     (TB, 896)      batch tile of x, K padded to 7*128
    w1_ref:    (896, 128)     layer-1 weight, in/out padded
    wrest_ref: (3, 128, 128)  layers 2..4 packed, all dims padded to 128
    b_ref:     (4, 128)       biases of all four layers, padded to 128 lanes
    o_ref:     (TB, 128)      lane-dense output slab (first 10 cols are real)
    """
    biases = b_ref[...].astype(jnp.float32)  # resident, loaded once per step
    wdtype = w1_ref.dtype

    h = jnp.dot(x_ref[...], w1_ref[...], preferred_element_type=jnp.float32)
    h = h + biases[0:1, :]
    h = jnp.dot(h.astype(wdtype), wrest_ref[0],
                preferred_element_type=jnp.float32) + biases[1:2, :]
    h = jnp.dot(h.astype(wdtype), wrest_ref[1],
                preferred_element_type=jnp.float32) + biases[2:3, :]
    h = jnp.dot(h.astype(wdtype), wrest_ref[2],
                preferred_element_type=jnp.float32) + biases[3:4, :]
    # (TB, 128) lane-dense store -> full vst, no masked partial stores.
    o_ref[...] = h.astype(o_ref.dtype)


def fused_mlp(x, packed_params, out_features=_OUT):
    """packed_params = (w1_pad (896,128), wrest (3,128,128), biases (4,128))."""
    w1, wrest, biases = packed_params
    B, in_dim = x.shape
    assert in_dim == _IN

    # Pad contraction dim 784 -> 896 once in the wrapper (zeros contribute 0).
    x_p = jnp.pad(x, ((0, 0), (0, _K_PAD - in_dim))).astype(w1.dtype)

    # Single step for small batches; 512-row tiles (grid > 1) stream across
    # TensorCores on v7x via the "parallel" dimension semantics.
    TB = B if B <= _MAX_TB else _MAX_TB
    grid = (pl.cdiv(B, TB),)

    itemsize = jnp.dtype(w1.dtype).itemsize
    flops = 2 * B * (_K_PAD * _LANE + 3 * _LANE * _LANE)
    bytes_accessed = ((x_p.size + w1.size + wrest.size) * itemsize
                      + biases.size * 4
                      + B * _LANE * jnp.dtype(x.dtype).itemsize)

    out_padded = pl.pallas_call(
        _fused_mlp_kernel,
        out_shape=jax.ShapeDtypeStruct((B, _LANE), x.dtype),
        grid=grid,
        in_specs=[
            pl.BlockSpec((TB, _K_PAD), lambda i: (i, 0)),           # x (batch tiled)
            pl.BlockSpec((_K_PAD, _LANE), lambda i: (0, 0)),        # W1 (resident)
            pl.BlockSpec((3, _LANE, _LANE), lambda i: (0, 0, 0)),   # W2..W4 packed
            pl.BlockSpec((4, _LANE), lambda i: (0, 0)),             # biases packed
        ],
        out_specs=pl.BlockSpec((TB, _LANE), lambda i: (i, 0)),
        compiler_params=pltpu.CompilerParams(
            dimension_semantics=("parallel",)),
        cost_estimate=pl.CostEstimate(
            flops=flops, transcendentals=0, bytes_accessed=bytes_accessed),
    )(x_p, w1, wrest, biases)

    return out_padded[:, :out_features]


def init_linear_params(key, in_features, out_features, dtype=jnp.float32):
    """Deterministic init mimicking nn.Linear's uniform(-1/sqrt(in), 1/sqrt(in))."""
    kw, kb = jax.random.split(key)
    bound = 1.0 / jnp.sqrt(jnp.float32(in_features))
    # Stored directly in (in, out) layout (== PyTorch weight transposed).
    w = jax.random.uniform(kw, (in_features, out_features), dtype,
                           minval=-bound, maxval=bound)
    b = jax.random.uniform(kb, (out_features,), dtype,
                           minval=-bound, maxval=bound)
    return w, b


def make_mlp_params(key, a, b, c, dtype=jnp.float32):
    dims = [(_IN, a), (a, b), (b, c), (c, _OUT)]
    keys = jax.random.split(key, len(dims))
    return [init_linear_params(k, i, o, dtype) for k, (i, o) in zip(keys, dims)]


def pack_params_for_kernel(params, compute_dtype=jnp.float32):
    """Zero-pad every dim to lane multiples and pack layers into 3 arrays.

    Padding is mathematically exact: zero columns/rows contribute nothing.
    `compute_dtype=jnp.bfloat16` halves x/weight HBM bytes for large-batch
    runs on v6e/v7x (biases + accumulation stay f32); default f32 matches the
    PyTorch reference numerics.
    """
    (w1, b1), (w2, b2), (w3, b3), (w4, b4) = params

    def pad_w(w, rows, cols):
        return jnp.pad(w, ((0, rows - w.shape[0]), (0, cols - w.shape[1])))

    def pad_b(b):
        return jnp.pad(b, (0, _LANE - b.shape[0]))

    w1_p = pad_w(w1, _K_PAD, _LANE).astype(compute_dtype)
    wrest = jnp.stack([pad_w(w2, _LANE, _LANE),
                       pad_w(w3, _LANE, _LANE),
                       pad_w(w4, _LANE, _LANE)]).astype(compute_dtype)
    biases = jnp.stack([pad_b(b1), pad_b(b2),
                        pad_b(b3), pad_b(b4)]).astype(jnp.float32)
    return w1_p, wrest, biases


@jax.jit
def mlp_forward(x, packed_params):
    return fused_mlp(x, packed_params, out_features=_OUT)


if __name__ == "__main__":
    # Small, forward-consistent shapes: batch=8, hidden dims a=32, b=64, c=16.
    a_dim, b_dim, c_dim = 32, 64, 16
    batch = 8

    key = jax.random.PRNGKey(0)
    k_x, k_p = jax.random.split(key)

    x = jax.random.normal(k_x, (batch, _IN), dtype=jnp.float32)
    params = make_mlp_params(k_p, a_dim, b_dim, c_dim)
    packed = pack_params_for_kernel(params)  # f32 path (matches reference)

    out = mlp_forward(x, packed)
    out = jax.block_until_ready(out)

    # Sanity check against plain-JAX reference (same math, same unpadded params).
    ref = x
    for w, bias in params:
        ref = ref @ w + bias
    assert out.shape == (batch, _OUT)
    assert jnp.allclose(out, ref, atol=1e-4, rtol=1e-4)

    print("KERNEL_OK")
</pallas_src>

<mosaic_0001>
module attributes {stable_mosaic.version = 11 : i64} {
  func.func @_fused_mlp_kernel(%arg0: i32, %arg1: memref<8x896xf32, #tpu.memory_space<vmem>>, %arg2: memref<896x128xf32, #tpu.memory_space<vmem>>, %arg3: memref<3x128x128xf32, #tpu.memory_space<vmem>>, %arg4: memref<4x128xf32, #tpu.memory_space<vmem>>, %arg5: memref<8x128xf32, #tpu.memory_space<vmem>>) attributes {dimension_semantics = [#tpu.dimension_semantics<parallel>], iteration_bounds = array<i64: 1>, scalar_prefetch = 0 : i64, scratch_operands = 0 : i64, tpu.core_type = #tpu.core_type<tc>, window_params = [{transform_indices = @transform_0, window_bounds = array<i64: 8, 896>}, {pipeline_mode = #tpu.pipeline_mode<synchronous>, transform_indices = @transform_1, window_bounds = array<i64: 896, 128>}, {pipeline_mode = #tpu.pipeline_mode<synchronous>, transform_indices = @transform_2, window_bounds = array<i64: 3, 128, 128>}, {pipeline_mode = #tpu.pipeline_mode<synchronous>, transform_indices = @transform_3, window_bounds = array<i64: 4, 128>}, {transform_indices = @transform_4, window_bounds = array<i64: 8, 128>}]} {
    %c0 = arith.constant 0 : index
    %c0_0 = arith.constant 0 : index
    %0 = vector.load %arg4[%c0, %c0_0] : memref<4x128xf32, #tpu.memory_space<vmem>>, vector<4x128xf32>
    %c0_1 = arith.constant 0 : index
    %c0_2 = arith.constant 0 : index
    %1 = vector.load %arg1[%c0_1, %c0_2] : memref<8x896xf32, #tpu.memory_space<vmem>>, vector<8x896xf32>
    %c0_3 = arith.constant 0 : index
    %c0_4 = arith.constant 0 : index
    %2 = vector.load %arg2[%c0_3, %c0_4] : memref<896x128xf32, #tpu.memory_space<vmem>>, vector<896x128xf32>
    %cst = arith.constant dense<0.000000e+00> : vector<8x128xf32>
    %3 = tpu.matmul %1, %2, %cst {dimension_numbers = #tpu.dot_dimension_numbers<[1], [0], [0], [1], [0, 0, 1, 1], [], []>} : vector<8x896xf32>, vector<896x128xf32>, vector<8x128xf32> -> vector<8x128xf32>
    %4 = vector.extract_strided_slice %0 {offsets = [0, 0], sizes = [1, 128], strides = [1, 1]} : vector<4x128xf32> to vector<1x128xf32>
    %5 = vector.broadcast %4 : vector<1x128xf32> to vector<8x128xf32>
    %6 = arith.addf %3, %5 : vector<8x128xf32>
    %c0_5 = arith.constant 0 : index
    %c0_6 = arith.constant 0 : index
    %c0_7 = arith.constant 0 : index
    %7 = vector.load %arg3[%c0_5, %c0_6, %c0_7] : memref<3x128x128xf32, #tpu.memory_space<vmem>>, vector<1x128x128xf32>
    %8 = vector.shape_cast %7 : vector<1x128x128xf32> to vector<128x128xf32>
    %cst_8 = arith.constant dense<0.000000e+00> : vector<8x128xf32>
    %9 = tpu.matmul %6, %8, %cst_8 {dimension_numbers = #tpu.dot_dimension_numbers<[1], [0], [0], [1], [0, 0, 1, 1], [], []>} : vector<8x128xf32>, vector<128x128xf32>, vector<8x128xf32> -> vector<8x128xf32>
    %10 = vector.extract_strided_slice %0 {offsets = [1, 0], sizes = [1, 128], strides = [1, 1]} : vector<4x128xf32> to vector<1x128xf32>
    %11 = vector.broadcast %10 : vector<1x128xf32> to vector<8x128xf32>
    %12 = arith.addf %9, %11 : vector<8x128xf32>
    %c1 = arith.constant 1 : index
    %c0_9 = arith.constant 0 : index
    %c0_10 = arith.constant 0 : index
    %13 = vector.load %arg3[%c1, %c0_9, %c0_10] : memref<3x128x128xf32, #tpu.memory_space<vmem>>, vector<1x128x128xf32>
    %14 = vector.shape_cast %13 : vector<1x128x128xf32> to vector<128x128xf32>
    %cst_11 = arith.constant dense<0.000000e+00> : vector<8x128xf32>
    %15 = tpu.matmul %12, %14, %cst_11 {dimension_numbers = #tpu.dot_dimension_numbers<[1], [0], [0], [1], [0, 0, 1, 1], [], []>} : vector<8x128xf32>, vector<128x128xf32>, vector<8x128xf32> -> vector<8x128xf32>
    %16 = vector.extract_strided_slice %0 {offsets = [2, 0], sizes = [1, 128], strides = [1, 1]} : vector<4x128xf32> to vector<1x128xf32>
    %17 = vector.broadcast %16 : vector<1x128xf32> to vector<8x128xf32>
    %18 = arith.addf %15, %17 : vector<8x128xf32>
    %c2 = arith.constant 2 : index
    %c0_12 = arith.constant 0 : index
    %c0_13 = arith.constant 0 : index
    %19 = vector.load %arg3[%c2, %c0_12, %c0_13] : memref<3x128x128xf32, #tpu.memory_space<vmem>>, vector<1x128x128xf32>
    %20 = vector.shape_cast %19 : vector<1x128x128xf32> to vector<128x128xf32>
    %cst_14 = arith.constant dense<0.000000e+00> : vector<8x128xf32>
    %21 = tpu.matmul %18, %20, %cst_14 {dimension_numbers = #tpu.dot_dimension_numbers<[1], [0], [0], [1], [0, 0, 1, 1], [], []>} : vector<8x128xf32>, vector<128x128xf32>, vector<8x128xf32> -> vector<8x128xf32>
    %22 = vector.extract_strided_slice %0 {offsets = [3, 0], sizes = [1, 128], strides = [1, 1]} : vector<4x128xf32> to vector<1x128xf32>
    %23 = vector.broadcast %22 : vector<1x128xf32> to vector<8x128xf32>
    %24 = arith.addf %21, %23 : vector<8x128xf32>
    %c0_15 = arith.constant 0 : index
    %c0_16 = arith.constant 0 : index
    %25 = vector.load %arg5[%c0_15, %c0_16] : memref<8x128xf32, #tpu.memory_space<vmem>>, vector<8x128xf32>
    tpu.vector_store %arg5[%c0_15, %c0_16], %24 {strides = array<i32>} : memref<8x128xf32, #tpu.memory_space<vmem>>, vector<8x128xf32>,
    return
  }
  func.func @transform_0(%arg0: i32) -> (i32, i32) {
    %c0_i32 = arith.constant 0 : i32
    %c0_i32_0 = arith.constant 0 : i32
    return %arg0, %c0_i32 : i32, i32
  }
  func.func @transform_1(%arg0: i32) -> (i32, i32) {
    %c0_i32 = arith.constant 0 : i32
    %c0_i32_0 = arith.constant 0 : i32
    %c0_i32_1 = arith.constant 0 : i32
    return %c0_i32, %c0_i32_0 : i32, i32
  }
  func.func @transform_2(%arg0: i32) -> (i32, i32, i32) {
    %c0_i32 = arith.constant 0 : i32
    %c0_i32_0 = arith.constant 0 : i32
    %c0_i32_1 = arith.constant 0 : i32
    %c0_i32_2 = arith.constant 0 : i32
    return %c0_i32, %c0_i32_0, %c0_i32_1 : i32, i32, i32
  }
  func.func @transform_3(%arg0: i32) -> (i32, i32) {
    %c0_i32 = arith.constant 0 : i32
    %c0_i32_0 = arith.constant 0 : i32
    %c0_i32_1 = arith.constant 0 : i32
    return %c0_i32, %c0_i32_0 : i32, i32
  }
  func.func @transform_4(%arg0: i32) -> (i32, i32) {
    %c0_i32 = arith.constant 0 : i32
    %c0_i32_0 = arith.constant 0 : i32
    return %arg0, %c0_i32 : i32, i32
  }
}

</mosaic_0001>

<bundles_post_ra>
// kernel: mlp_forward.1
= control target key start
LH: loop header
LB: loop body
LE: loop exit
PB: predicated region body
PF: predicated region fallthrough
CT: control target
= control target key end

     0   :  { %9 = vsyncpa [#allocation3], 0  ;;  %s1274_s0 = inlined_call_operand.vmem [shape: f32[8,896], index: 0, kind: input, shape index: {}]   ;;  %s1275_s1 = inlined_call_operand.hbm [shape: f32[896,128], index: 1, kind: input, shape index: {}]   ;;  %s1276_s2 = inlined_call_operand.hbm [shape: f32[3,128,128], index: 2, kind: input, shape index: {}]   ;;  %s1277_s3 = inlined_call_operand.vmem [shape: f32[4,128], index: 3, kind: input, shape index: {}]   ;;  %s1278_s4 = inlined_call_operand.hbm [shape: f32[8,128], index: 4, kind: output, shape index: {}]  }
   0x1   :  { %10 = vsyncpa [#allocation6], 0 }
   0x2   :  { %11 = vsyncpa [#allocation4], 0  ;;  %s1125_s15 = smov [#allocation2]  }
   0x3   :  { %s19_s16 = sshll.u32 %s1125_s15, 4  ;;  %s20_s16 = int_to_ptr.vmem [resolvable:$true] %s19_s16 }
   0x4   :  { %s1067_s17 = scalar_lea.vmem %s20_s16, 14336  ;;  %p1072_p1 = scmp.lt.s32.totalorder %s20_s16, %s20_s16 }
   0x5   :  { %p1068_p0 = scmp.ne.s32.totalorder %s20_s16, %s1067_s17  ;;  %p1073_p2 = scmp.lt.s32.totalorder %s1067_s17, %s1067_s17 }
   0x7   :  { %p1074_p3 = por %p1073_p2, %p1072_p1 }
   0x9   :  { %p1075_p4 = pnand %p1074_p3, %p1068_p0 }
   0xb   :  { %1078 = shalt.err (!%p1075_p4)
}
   0xc   :  { %s1126_s18 = smov 128   ;;  %s1127_s19 = smov 8  }
   0xd   :  { %25 = dma.hbm_to_vmem [thread:$0]  %s1275_s1, 14336, %s20_s16, [#allocation3], %s1126_s18, %s1126_s18, %s1127_s19  }
   0xe   :  { %s1128_s22 = smov [#allocation5]  }
   0xf   :  { %s31_s23 = sshll.u32 %s1128_s22, 4  ;;  %s32_s23 = int_to_ptr.vmem [resolvable:$true] %s31_s23 }
  0x10   :  { %s1087_s24 = scalar_lea.vmem %s32_s23, 6144  ;;  %p1092_p6 = scmp.lt.s32.totalorder %s32_s23, %s32_s23 }
  0x11   :  { %p1088_p5 = scmp.ne.s32.totalorder %s32_s23, %s1087_s24  ;;  %p1093_p7 = scmp.lt.s32.totalorder %s1087_s24, %s1087_s24 }
  0x13   :  { %p1094_p8 = por %p1093_p7, %p1092_p6 }
  0x15   :  { %p1095_p9 = pnand %p1094_p8, %p1088_p5 }
  0x17   :  { %1098 = shalt.err (!%p1095_p9)
}
  0x18   :  { %37 = dma.hbm_to_vmem [thread:$0]  %s1276_s2, 6144, %s32_s23, [#allocation6], %s1126_s18, %s1126_s18, %s1127_s19  }
  0x19   :  { %1119 = dma.done.wait [#allocation3], 14336  }
  0x1a   :  { %1120 = vsyncadd [#allocation3], 4294952960 }
  0x1b   :  { %1121 = dma.done.wait [#allocation6], 6144  }
  0x1c   :  { %1122 = vsyncadd [#allocation6], 4294961152  ;;  %v85_v0 = vld [vmem:[#allocation2 + $0xf8] sm:$0xff]  ;;  %v84_v2 = vld [vmem:[#allocation2 + $0xf0] sm:$0xff]  ;;  %vm1130_vm0 = vmmov 0  }
  0x1d   :  { %v69_v1 = vld [vmem:[#allocation2 + $0x78] sm:$0xff]  ;;  %739 = vmatprep.subr.mxu0 %v85_v0  ;;  %v68_v4 = vld [vmem:[#allocation2 + $0x70] sm:$0xff]  ;;  %v83_v6 = vld [vmem:[#allocation2 + $0xe8] sm:$0xff] }
  0x1e   :  { %v117_v3 = vld [vmem:[#allocation2 + $0x1f8] sm:$0xff]  ;;  %740 = vmatpush3.msra.mxu0 %v69_v1  ;;  %v116_v7 = vld [vmem:[#allocation2 + $0x1f0] sm:$0xff]  ;;  %v67_v8 = vld [vmem:[#allocation2 + $0x68] sm:$0xff] }
  0x1f   :  { %v101_v5 = vld [vmem:[#allocation2 + $0x178] sm:$0xff]  ;;  %774 = vmatprep.subr.mxu1 %v117_v3  ;;  %741 = vmatprep.subr.mxu0 %v84_v2  ;;  %v100_v9 = vld [vmem:[#allocation2 + $0x170] sm:$0xff]  ;;  %v115_v10 = vld [vmem:[#allocation2 + $0x1e8] sm:$0xff] }
  0x20   :  { %775 = vmatpush3.msra.mxu1 %v101_v5  ;;  %742 = vmatpush3.msra.mxu0 %v68_v4  ;;  %v82_v11 = vld [vmem:[#allocation2 + $0xe0] sm:$0xff]  ;;  %v99_v12 = vld [vmem:[#allocation2 + $0x168] sm:$0xff]  ;;  %v81_v15 = vld [vmem:[#allocation2 + $0xd8] sm:$0xff] }
  0x21   :  { %776 = vmatprep.subr.mxu1 %v116_v7  ;;  %743 = vmatprep.subr.mxu0 %v83_v6  ;;  %v66_v13 = vld [vmem:[#allocation2 + $0x60] sm:$0xff]  ;;  %v65_v17 = vld [vmem:[#allocation2 + $0x58] sm:$0xff]  ;;  %v80_v19 = vld [vmem:[#allocation2 + $0xd0] sm:$0xff] }
  0x22   :  { %777 = vmatpush3.msra.mxu1 %v100_v9  ;;  %v114_v14 = vld [vmem:[#allocation2 + $0x1e0] sm:$0xff]  ;;  %744 = vmatpush3.msra.mxu0 %v67_v8  ;;  %v113_v18 = vld [vmem:[#allocation2 + $0x1d8] sm:$0xff]  ;;  %v64_v21 = vld [vmem:[#allocation2 + $0x50] sm:$0xff] }
  0x23   :  { %778 = vmatprep.subr.mxu1 %v115_v10  ;;  %v98_v16 = vld [vmem:[#allocation2 + $0x160] sm:$0xff]  ;;  %745 = vmatprep.subr.mxu0 %v82_v11  ;;  %v97_v20 = vld [vmem:[#allocation2 + $0x158] sm:$0xff]  ;;  %v112_v22 = vld [vmem:[#allocation2 + $0x1d0] sm:$0xff]  ;;  %v1129_v11 = vmov 0.0  }
  0x24   :  { %779 = vmatpush3.msra.mxu1 %v99_v12  ;;  %746 = vmatpush3.msra.mxu0 %v66_v13  ;;  %v79_v23 = vld [vmem:[#allocation2 + $0xc8] sm:$0xff]  ;;  %v96_v24 = vld [vmem:[#allocation2 + $0x150] sm:$0xff]  ;;  %v78_v27 = vld [vmem:[#allocation2 + $0xc0] sm:$0xff] }
  0x25   :  { %780 = vmatprep.subr.mxu1 %v114_v14  ;;  %747 = vmatprep.subr.mxu0 %v81_v15  ;;  %v63_v25 = vld [vmem:[#allocation2 + $0x48] sm:$0xff]  ;;  %v62_v29 = vld [vmem:[#allocation2 + $0x40] sm:$0xff]  ;;  %v77_v31 = vld [vmem:[#allocation2 + $0xb8] sm:$0xff] }
  0x26   :  { %781 = vmatpush3.msra.mxu1 %v98_v16  ;;  %748 = vmatpush3.msra.mxu0 %v65_v17  ;;  %v111_v26 = vld [vmem:[#allocation2 + $0x1c8] sm:$0xff]  ;;  %v110_v30 = vld [vmem:[#allocation2 + $0x1c0] sm:$0xff]  ;;  %v61_v33 = vld [vmem:[#allocation2 + $0x38] sm:$0xff] }
  0x27   :  { %782 = vmatprep.subr.mxu1 %v113_v18  ;;  %749 = vmatprep.subr.mxu0 %v80_v19  ;;  %v95_v28 = vld [vmem:[#allocation2 + $0x148] sm:$0xff]  ;;  %v94_v32 = vld [vmem:[#allocation2 + $0x140] sm:$0xff]  ;;  %v109_v34 = vld [vmem:[#allocation2 + $0x1b8] sm:$0xff] }
  0x28   :  { %783 = vmatpush3.msra.mxu1 %v97_v20  ;;  %750 = vmatpush3.msra.mxu0 %v64_v21  ;;  %v76_v35 = vld [vmem:[#allocation2 + $0xb0] sm:$0xff]  ;;  %v93_v36 = vld [vmem:[#allocation2 + $0x138] sm:$0xff]  ;;  %v75_v39 = vld [vmem:[#allocation2 + $0xa8] sm:$0xff] }
  0x29   :  { %784 = vmatprep.subr.mxu1 %v112_v22  ;;  %751 = vmatprep.subr.mxu0 %v79_v23  ;;  %v60_v37 = vld [vmem:[#allocation2 + $0x30] sm:$0xff]  ;;  %v59_v41 = vld [vmem:[#allocation2 + $0x28] sm:$0xff]  ;;  %v74_v43 = vld [vmem:[#allocation2 + $0xa0] sm:$0xff] }
  0x2a   :  { %785 = vmatpush3.msra.mxu1 %v96_v24  ;;  %752 = vmatpush3.msra.mxu0 %v63_v25  ;;  %v108_v38 = vld [vmem:[#allocation2 + $0x1b0] sm:$0xff]  ;;  %v107_v42 = vld [vmem:[#allocation2 + $0x1a8] sm:$0xff]  ;;  %v58_v45 = vld [vmem:[#allocation2 + $0x20] sm:$0xff] }
  0x2b   :  { %786 = vmatprep.subr.mxu1 %v111_v26  ;;  %753 = vmatprep.subr.mxu0 %v78_v27  ;;  %v92_v40 = vld [vmem:[#allocation2 + $0x130] sm:$0xff]  ;;  %v91_v44 = vld [vmem:[#allocation2 + $0x128] sm:$0xff]  ;;  %v106_v46 = vld [vmem:[#allocation2 + $0x1a0] sm:$0xff] }
  0x2c   :  { %787 = vmatpush3.msra.mxu1 %v95_v28  ;;  %754 = vmatpush3.msra.mxu0 %v62_v29  ;;  %v73_v47 = vld [vmem:[#allocation2 + $0x98] sm:$0xff]  ;;  %v90_v48 = vld [vmem:[#allocation2 + $0x120] sm:$0xff]  ;;  %v72_v51 = vld [vmem:[#allocation2 + $0x90] sm:$0xff] }
  0x2d   :  { %788 = vmatprep.subr.mxu1 %v110_v30  ;;  %755 = vmatprep.subr.mxu0 %v77_v31  ;;  %v57_v49 = vld [vmem:[#allocation2 + $0x18] sm:$0xff]  ;;  %v56_v53 = vld [vmem:[#allocation2 + $0x10] sm:$0xff]  ;;  %v71_v55 = vld [vmem:[#allocation2 + $0x88] sm:$0xff] }
  0x2e   :  { %789 = vmatpush3.msra.mxu1 %v94_v32  ;;  %756 = vmatpush3.msra.mxu0 %v61_v33  ;;  %v105_v50 = vld [vmem:[#allocation2 + $0x198] sm:$0xff]  ;;  %v104_v54 = vld [vmem:[#allocation2 + $0x190] sm:$0xff]  ;;  %v55_v57 = vld [vmem:[#allocation2 + $0x8] sm:$0xff] }
  0x2f   :  { %790 = vmatprep.subr.mxu1 %v109_v34  ;;  %757 = vmatprep.subr.mxu0 %v76_v35  ;;  %v89_v52 = vld [vmem:[#allocation2 + $0x118] sm:$0xff]  ;;  %v88_v56 = vld [vmem:[#allocation2 + $0x110] sm:$0xff]  ;;  %v103_v58 = vld [vmem:[#allocation2 + $0x188] sm:$0xff] }
  0x30   :  { %791 = vmatpush3.msra.mxu1 %v93_v36  ;;  %758 = vmatpush3.msra.mxu0 %v60_v37  ;;  %v70_v59 = vld [vmem:[#allocation2 + $0x80] sm:$0xff]  ;;  %v48_v60 = vld [vmem:[%s1274_s0 + $0x8] sm:$0xff]  ;;  %v149_v1 = vld [vmem:[#allocation2 + $0x2f8] sm:$0xff] }
  0x31   :  { %792 = vmatprep.subr.mxu1 %v108_v38  ;;  %759 = vmatprep.subr.mxu0 %v75_v39  ;;  %v54_v61 = vld [vmem:[#allocation2] sm:$0xff]  ;;  %v87_v62 = vld [vmem:[#allocation2 + $0x108] sm:$0xff]  ;;  %v50_v3 = vld [vmem:[%s1274_s0 + $0x18] sm:$0xff] }
  0x32   :  { %793 = vmatpush3.msra.mxu1 %v92_v40  ;;  %760 = vmatpush3.msra.mxu0 %v59_v41  ;;  %v47_v63 = vld [vmem:[%s1274_s0] sm:$0xff]  ;;  %v133_v4 = vld [vmem:[#allocation2 + $0x278] sm:$0xff]  ;;  %v49_v5 = vld [vmem:[%s1274_s0 + $0x10] sm:$0xff] }
  0x33   :  { %794 = vmatprep.subr.mxu1 %v107_v42  ;;  %761 = vmatprep.subr.mxu0 %v74_v43  ;;  %v102_v0 = vld [vmem:[#allocation2 + $0x180] sm:$0xff]  ;;  %v148_v6 = vld [vmem:[#allocation2 + $0x2f0] sm:$0xff]  ;;  %v147_v8 = vld [vmem:[#allocation2 + $0x2e8] sm:$0xff] }
  0x34   :  { %795 = vmatpush3.msra.mxu1 %v91_v44  ;;  %762 = vmatpush3.msra.mxu0 %v58_v45  ;;  %v86_v2 = vld [vmem:[#allocation2 + $0x100] sm:$0xff]  ;;  %v132_v7 = vld [vmem:[#allocation2 + $0x270] sm:$0xff]  ;;  %v165_v9 = vld [vmem:[#allocation2 + $0x378] sm:$0xff] }
  0x35   :  { %796 = vmatprep.subr.mxu1 %v106_v46  ;;  %763 = vmatprep.subr.mxu0 %v73_v47  ;;  %v131_v10 = vld [vmem:[#allocation2 + $0x268] sm:$0xff]  ;;  %v146_v12 = vld [vmem:[#allocation2 + $0x2e0] sm:$0xff]  ;;  %v164_v13 = vld [vmem:[#allocation2 + $0x370] sm:$0xff] }
  0x36   :  { %797 = vmatpush3.msra.mxu1 %v90_v48  ;;  %764 = vmatpush3.msra.mxu0 %v57_v49  ;;  %v130_v14 = vld [vmem:[#allocation2 + $0x260] sm:$0xff]  ;;  %v145_v15 = vld [vmem:[#allocation2 + $0x2d8] sm:$0xff]  ;;  %v163_v16 = vld [vmem:[#allocation2 + $0x368] sm:$0xff] }
  0x37   :  { %798 = vmatprep.subr.mxu1 %v105_v50  ;;  %765 = vmatprep.subr.mxu0 %v72_v51  ;;  %v129_v17 = vld [vmem:[#allocation2 + $0x258] sm:$0xff]  ;;  %v144_v18 = vld [vmem:[#allocation2 + $0x2d0] sm:$0xff]  ;;  %v162_v19 = vld [vmem:[#allocation2 + $0x360] sm:$0xff] }
  0x38   :  { %799 = vmatpush3.msra.mxu1 %v89_v52  ;;  %766 = vmatpush3.msra.mxu0 %v56_v53  ;;  %v128_v20 = vld [vmem:[#allocation2 + $0x250] sm:$0xff]  ;;  %v143_v21 = vld [vmem:[#allocation2 + $0x2c8] sm:$0xff]  ;;  %v161_v22 = vld [vmem:[#allocation2 + $0x358] sm:$0xff] }
  0x39   :  { %800 = vmatprep.subr.mxu1 %v104_v54  ;;  %767 = vmatprep.subr.mxu0 %v71_v55  ;;  %v127_v23 = vld [vmem:[#allocation2 + $0x248] sm:$0xff]  ;;  %v142_v24 = vld [vmem:[#allocation2 + $0x2c0] sm:$0xff]  ;;  %v160_v25 = vld [vmem:[#allocation2 + $0x350] sm:$0xff] }
  0x3a   :  { %801 = vmatpush3.msra.mxu1 %v88_v56  ;;  %768 = vmatpush3.msra.mxu0 %v55_v57  ;;  %v126_v26 = vld [vmem:[#allocation2 + $0x240] sm:$0xff]  ;;  %v141_v27 = vld [vmem:[#allocation2 + $0x2b8] sm:$0xff]  ;;  %v159_v28 = vld [vmem:[#allocation2 + $0x348] sm:$0xff] }
  0x3b   :  { %802 = vmatprep.subr.mxu1 %v103_v58  ;;  %769 = vmatprep.subr.mxu0 %v70_v59  ;;  %v125_v29 = vld [vmem:[#allocation2 + $0x238] sm:$0xff]  ;;  %v140_v30 = vld [vmem:[#allocation2 + $0x2b0] sm:$0xff]  ;;  %v158_v31 = vld [vmem:[#allocation2 + $0x340] sm:$0xff] }
  0x3c   :  { %234 = vmatprep.mubr.f32.mxu0 %v48_v60  ;;  %770 = vmatpush3.msra.mxu0 %v54_v61  ;;  %v124_v32 = vld [vmem:[#allocation2 + $0x230] sm:$0xff]  ;;  %v139_v33 = vld [vmem:[#allocation2 + $0x2a8] sm:$0xff]  ;;  %v157_v34 = vld [vmem:[#allocation2 + $0x338] sm:$0xff] }
  0x3d   :  { %803 = vmatpush3.msra.mxu1 %v87_v62  ;;  %235 = vmatmul.mubr.f32.vlgmr.msra.gmra.mxu0 %v47_v63  ;;  %v123_v35 = vld [vmem:[#allocation2 + $0x228] sm:$0xff]  ;;  %v138_v36 = vld [vmem:[#allocation2 + $0x2a0] sm:$0xff]  ;;  %v156_v37 = vld [vmem:[#allocation2 + $0x330] sm:$0xff] }
  0x3e   :  { %804 = vmatprep.subr.mxu1 %v102_v0  ;;  %809 = vmatprep.subr.mxu0 %v149_v1  ;;  %v122_v38 = vld [vmem:[#allocation2 + $0x220] sm:$0xff]  ;;  %v137_v39 = vld [vmem:[#allocation2 + $0x298] sm:$0xff]  ;;  %v155_v40 = vld [vmem:[#allocation2 + $0x328] sm:$0xff] }
  0x3f   :  { %805 = vmatpush3.msra.mxu1 %v86_v2  ;;  %304 = vmatprep.mubr.f32.mxu1 %v50_v3  ;;  %v121_v41 = vld [vmem:[#allocation2 + $0x218] sm:$0xff]  ;;  %v136_v42 = vld [vmem:[#allocation2 + $0x290] sm:$0xff]  ;;  %v154_v43 = vld [vmem:[#allocation2 + $0x320] sm:$0xff] }
  0x40   :  { %810 = vmatpush3.msra.mxu0 %v133_v4  ;;  %305 = vmatmul.mubr.f32.vlgmr.msra.gmra.mxu1 %v49_v5  ;;  %v120_v44 = vld [vmem:[#allocation2 + $0x210] sm:$0xff]  ;;  %v135_v45 = vld [vmem:[#allocation2 + $0x288] sm:$0xff]  ;;  %v153_v46 = vld [vmem:[#allocation2 + $0x318] sm:$0xff] }
  0x41   :  { %811 = vmatprep.subr.mxu0 %v148_v6  ;;  %912 = vmatprep.subr.mxu1 %v1129_v11  ;;  %v119_v47 = vld [vmem:[#allocation2 + $0x208] sm:$0xff]  ;;  %v134_v48 = vld [vmem:[#allocation2 + $0x280] sm:$0xff]  ;;  %v152_v51 = vld [vmem:[#allocation2 + $0x310] sm:$0xff] }
  0x42   :  { %812 = vmatpush3.msra.mxu0 %v132_v7  ;;  %913 = vmatpush3.msra.mxu1 %v165_v9  ;;  %v52_v49 = vld [vmem:[%s1274_s0 + $0x28] sm:$0xff]  ;;  %v118_v50 = vld [vmem:[#allocation2 + $0x200] sm:$0xff]  ;;  %v53_v55 = vld [vmem:[%s1274_s0 + $0x30] sm:$0xff] }
  0x43   :  { %813 = vmatprep.subr.mxu0 %v147_v8  ;;  %914 = vmatprep.subr.mxu1 %v1129_v11  ;;  %v51_v52 = vld [vmem:[%s1274_s0 + $0x20] sm:$0xff]  ;;  %v151_v53 = vld [vmem:[#allocation2 + $0x308] sm:$0xff]  ;;  %v465_v56 = vld [vmem:[#allocation5 + $0x78] sm:$0xff] }
  0x44   :  { %814 = vmatpush3.msra.mxu0 %v131_v10  ;;  %915 = vmatpush3.msra.mxu1 %v164_v13  ;;  %v150_v54 = vld [vmem:[#allocation2 + $0x300] sm:$0xff]  ;;  %v464_v57 = vld [vmem:[#allocation5 + $0x70] sm:$0xff]  ;;  %v463_v58 = vld [vmem:[#allocation5 + $0x68] sm:$0xff] }
  0x45   :  { %815 = vmatprep.subr.mxu0 %v146_v12  ;;  %916 = vmatprep.subr.mxu1 %v1129_v11  ;;  %v462_v59 = vld [vmem:[#allocation5 + $0x60] sm:$0xff]  ;;  %v461_v60 = vld [vmem:[#allocation5 + $0x58] sm:$0xff]  ;;  %v460_v61 = vld [vmem:[#allocation5 + $0x50] sm:$0xff] }
  0x46   :  { %816 = vmatpush3.msra.mxu0 %v130_v14  ;;  %917 = vmatpush3.msra.mxu1 %v163_v16  ;;  %v459_v62 = vld [vmem:[#allocation5 + $0x48] sm:$0xff]  ;;  %v458_v63 = vld [vmem:[#allocation5 + $0x40] sm:$0xff]  ;;  %v457_v0 = vld [vmem:[#allocation5 + $0x38] sm:$0xff] }
  0x47   :  { %817 = vmatprep.subr.mxu0 %v145_v15  ;;  %918 = vmatprep.subr.mxu1 %v1129_v11  ;;  %v456_v1 = vld [vmem:[#allocation5 + $0x30] sm:$0xff]  ;;  %v455_v2 = vld [vmem:[#allocation5 + $0x28] sm:$0xff]  ;;  %v454_v3 = vld [vmem:[#allocation5 + $0x20] sm:$0xff] }
  0x48   :  { %818 = vmatpush3.msra.mxu0 %v129_v17  ;;  %919 = vmatpush3.msra.mxu1 %v162_v19  ;;  %v453_v4 = vld [vmem:[#allocation5 + $0x18] sm:$0xff]  ;;  %v452_v5 = vld [vmem:[#allocation5 + $0x10] sm:$0xff]  ;;  %v451_v6 = vld [vmem:[#allocation5 + $0x8] sm:$0xff] }
  0x49   :  { %819 = vmatprep.subr.mxu0 %v144_v18  ;;  %920 = vmatprep.subr.mxu1 %v1129_v11  ;;  %v450_v7 = vld [vmem:[#allocation5] sm:$0xff]  ;;  %v556_v8 = vld [vmem:[#allocation5 + $0xf8] sm:$0xff]  ;;  %v555_v9 = vld [vmem:[#allocation5 + $0xf0] sm:$0xff] }
  0x4a   :  { %820 = vmatpush3.msra.mxu0 %v128_v20  ;;  %921 = vmatpush3.msra.mxu1 %v161_v22  ;;  %v554_v10 = vld [vmem:[#allocation5 + $0xe8] sm:$0xff]  ;;  %v553_v12 = vld [vmem:[#allocation5 + $0xe0] sm:$0xff]  ;;  %v552_v13 = vld [vmem:[#allocation5 + $0xd8] sm:$0xff] }
  0x4b   :  { %821 = vmatprep.subr.mxu0 %v143_v21  ;;  %922 = vmatprep.subr.mxu1 %v1129_v11  ;;  %v551_v14 = vld [vmem:[#allocation5 + $0xd0] sm:$0xff]  ;;  %v550_v15 = vld [vmem:[#allocation5 + $0xc8] sm:$0xff]  ;;  %v549_v16 = vld [vmem:[#allocation5 + $0xc0] sm:$0xff] }
  0x4c   :  { %822 = vmatpush3.msra.mxu0 %v127_v23  ;;  %923 = vmatpush3.msra.mxu1 %v160_v25  ;;  %v548_v17 = vld [vmem:[#allocation5 + $0xb8] sm:$0xff]  ;;  %v547_v18 = vld [vmem:[#allocation5 + $0xb0] sm:$0xff]  ;;  %v546_v19 = vld [vmem:[#allocation5 + $0xa8] sm:$0xff]  ;;  %v166_v23 = vlaneseq }
  0x4d   :  { %823 = vmatprep.subr.mxu0 %v142_v24  ;;  %924 = vmatprep.subr.mxu1 %v1129_v11  ;;  %v545_v20 = vld [vmem:[#allocation5 + $0xa0] sm:$0xff]  ;;  %v544_v21 = vld [vmem:[#allocation5 + $0x98] sm:$0xff]  ;;  %v543_v22 = vld [vmem:[#allocation5 + $0x90] sm:$0xff] }
  0x4e   :  { %824 = vmatpush3.msra.mxu0 %v126_v26  ;;  %925 = vmatpush3.msra.mxu1 %v159_v28  ;;  %v1238_v24 = vshrl.u32 %v166_v23, 7 }
  0x4f   :  { %825 = vmatprep.subr.mxu0 %v141_v27  ;;  %926 = vmatprep.subr.mxu1 %v1129_v11  ;;  %v1244_v27 = vld [vmem:[%s1277_s3] sm:$0xf]  ;;  %s1131_s3 = smov [#allocation7]  }
  0x50   :  { %826 = vmatpush3.msra.mxu0 %v125_v29  ;;  %927 = vmatpush3.msra.mxu1 %v158_v31  ;;  %v168_v26 = vsub.s32 0, %v1238_v24  ;;  %s729_s14 = sshll.u32 %s1131_s3, 4  ;;  %s730_s14 = int_to_ptr.vmem [resolvable:$true] %s729_s14 }
  0x51   :  { %827 = vmatprep.subr.mxu0 %v140_v30  ;;  %928 = vmatprep.subr.mxu1 %v1129_v11  ;;  %s1099_s15 = scalar_lea.vmem %s730_s14, 128  ;;  %p1104_p11 = scmp.lt.s32.totalorder %s730_s14, %s730_s14 }
  0x52   :  { %828 = vmatpush3.msra.mxu0 %v124_v32  ;;  %929 = vmatpush3.msra.mxu1 %v157_v34  ;;  %v169_v30 = vrot.slane %v1244_v27, %v168_v26  ;;  %p1100_p10 = scmp.ne.s32.totalorder %s730_s14, %s1099_s15  ;;  %p1105_p12 = scmp.lt.s32.totalorder %s1099_s15, %s1099_s15 }
  0x53   :  { %829 = vmatprep.subr.mxu0 %v139_v33  ;;  %930 = vmatprep.subr.mxu1 %v1129_v11 }
  0x54   :  { %830 = vmatpush3.msra.mxu0 %v123_v35  ;;  %931 = vmatpush3.msra.mxu1 %v156_v37  ;;  %p1106_p13 = por %p1105_p12, %p1104_p11 }
  0x55   :  { %831 = vmatprep.subr.mxu0 %v138_v36  ;;  %932 = vmatprep.subr.mxu1 %v1129_v11 }
  0x56   :  { %832 = vmatpush3.msra.mxu0 %v122_v38  ;;  %933 = vmatpush3.msra.mxu1 %v155_v40  ;;  %p1107_p0 = pnand %p1106_p13, %p1100_p10 }
  0x57   :  { %833 = vmatprep.subr.mxu0 %v137_v39  ;;  %934 = vmatprep.subr.mxu1 %v1129_v11 }
  0x58   :  { %834 = vmatpush3.msra.mxu0 %v121_v41  ;;  %935 = vmatpush3.msra.mxu1 %v154_v43  ;;  %v542_v43 = vld [vmem:[#allocation5 + $0x88] sm:$0xff] }
  0x59   :  { %835 = vmatprep.subr.mxu0 %v136_v42  ;;  %936 = vmatprep.subr.mxu1 %v1129_v11 }
  0x5a   :  { %836 = vmatpush3.msra.mxu0 %v120_v44  ;;  %937 = vmatpush3.msra.mxu1 %v153_v46  ;;  %v541_v44 = vld [vmem:[#allocation5 + $0x80] sm:$0xff]  ;;  %v646_v46 = vld [vmem:[#allocation5 + $0x170] sm:$0xff] }
  0x5b   :  { %837 = vmatprep.subr.mxu0 %v135_v45  ;;  %938 = vmatprep.subr.mxu1 %v1129_v11  ;;  %v647_v45 = vld [vmem:[#allocation5 + $0x178] sm:$0xff] }
  0x5c   :  { %838 = vmatpush3.msra.mxu0 %v119_v47  ;;  %374 = vmatprep.mubr.f32.mxu0 %v52_v49  ;;  %v645_v47 = vld [vmem:[#allocation5 + $0x168] sm:$0xff]  ;;  %v643_v49 = vld [vmem:[#allocation5 + $0x158] sm:$0xff] }
  0x5d   :  { %839 = vmatprep.subr.mxu0 %v134_v48  ;;  %939 = vmatpush3.msra.mxu1 %v152_v51  ;;  %v644_v48 = vld [vmem:[#allocation5 + $0x160] sm:$0xff]  ;;  %v641_v51 = vld [vmem:[#allocation5 + $0x148] sm:$0xff] }
  0x5e   :  { %840 = vmatpush3.msra.mxu0 %v118_v50  ;;  %940 = vmatprep.subr.mxu1 %v1129_v11  ;;  %v642_v50 = vld [vmem:[#allocation5 + $0x150] sm:$0xff] }
  0x5f   :  { %375 = vmatmul.mubr.f32.vlgmr.msra.gmra.mxu0 %v51_v52  ;;  %941 = vmatpush3.msra.mxu1 %v151_v53  ;;  %v640_v52 = vld [vmem:[#allocation5 + $0x140] sm:$0xff]  ;;  %v639_v53 = vld [vmem:[#allocation5 + $0x138] sm:$0xff] }
  0x60   :  { %944 = vmatprep.mubr.msk.f32.mxu1 %vm1130_vm0, %v1129_v11  ;;  %942 = vmatprep.subr.mxu1 %v1129_v11 }
  0x61   :  { %947 = vmatprep.subr.mxu0 %v1129_v11  ;;  %943 = vmatpush3.msra.mxu1 %v150_v54  ;;  %v638_v54 = vld [vmem:[#allocation5 + $0x130] sm:$0xff] }
  0x62   :  { %979 = vmatprep.mubr.msk.f32.mxu0 %vm1130_vm0, %v1129_v11  ;;  %945 = vmatmul.mubr.f32.vlgmr.msra.gmra.mxu1 %v53_v55  ;;  %v637_v55 = vld [vmem:[#allocation5 + $0x128] sm:$0xff] }
  0x63   :  { %982 = vmatprep.subr.mxu1 %v1129_v11  ;;  %1014 = vmatprep.mubr.msk.f32.mxu1 %vm1130_vm0, %v1129_v11 }
  0x64   :  { %948 = vmatpush3.msra.mxu0 %v465_v56  ;;  %983 = vmatpush3.msra.mxu1 %v556_v8  ;;  %v636_v56 = vld [vmem:[#allocation5 + $0x120] sm:$0xff] }
  0x65   :  { %949 = vmatprep.subr.mxu0 %v1129_v11  ;;  %984 = vmatprep.subr.mxu1 %v1129_v11 }
  0x66   :  { %950 = vmatpush3.msra.mxu0 %v464_v57  ;;  %985 = vmatpush3.msra.mxu1 %v555_v9  ;;  %v635_v57 = vld [vmem:[#allocation5 + $0x118] sm:$0xff] }
  0x67   :  { %951 = vmatprep.subr.mxu0 %v1129_v11  ;;  %986 = vmatprep.subr.mxu1 %v1129_v11 }
  0x68   :  { %952 = vmatpush3.msra.mxu0 %v463_v58  ;;  %987 = vmatpush3.msra.mxu1 %v554_v10  ;;  %v634_v58 = vld [vmem:[#allocation5 + $0x110] sm:$0xff] }
  0x69   :  { %953 = vmatprep.subr.mxu0 %v1129_v11  ;;  %988 = vmatprep.subr.mxu1 %v1129_v11 }
  0x6a   :  { %954 = vmatpush3.msra.mxu0 %v462_v59  ;;  %989 = vmatpush3.msra.mxu1 %v553_v12  ;;  %v468_v59 = vsub.s32 1, %v1238_v24 }
  0x6b   :  { %955 = vmatprep.subr.mxu0 %v1129_v11  ;;  %990 = vmatprep.subr.mxu1 %v1129_v11 }
  0x6c   :  { %956 = vmatpush3.msra.mxu0 %v461_v60  ;;  %991 = vmatpush3.msra.mxu1 %v552_v13  ;;  %v469_v60 = vrot.slane %v1244_v27, %v468_v59 }
  0x6d   :  { %957 = vmatprep.subr.mxu0 %v1129_v11  ;;  %992 = vmatprep.subr.mxu1 %v1129_v11 }
  0x6e   :  { %958 = vmatpush3.msra.mxu0 %v460_v61  ;;  %993 = vmatpush3.msra.mxu1 %v551_v14 }
  0x6f   :  { %959 = vmatprep.subr.mxu0 %v1129_v11  ;;  %994 = vmatprep.subr.mxu1 %v1129_v11 }
  0x70   :  { %960 = vmatpush3.msra.mxu0 %v459_v62  ;;  %995 = vmatpush3.msra.mxu1 %v550_v15 }
  0x71   :  { %961 = vmatprep.subr.mxu0 %v1129_v11  ;;  %996 = vmatprep.subr.mxu1 %v1129_v11 }
  0x72   :  { %962 = vmatpush3.msra.mxu0 %v458_v63  ;;  %997 = vmatpush3.msra.mxu1 %v549_v16 }
  0x73   :  { %963 = vmatprep.subr.mxu0 %v1129_v11  ;;  %998 = vmatprep.subr.mxu1 %v1129_v11 }
  0x74   :  { %964 = vmatpush3.msra.mxu0 %v457_v0  ;;  %999 = vmatpush3.msra.mxu1 %v548_v17  ;;  %v633_v0 = vld [vmem:[#allocation5 + $0x108] sm:$0xff] }
  0x75   :  { %965 = vmatprep.subr.mxu0 %v1129_v11  ;;  %1000 = vmatprep.subr.mxu1 %v1129_v11 }
  0x76   :  { %966 = vmatpush3.msra.mxu0 %v456_v1  ;;  %1001 = vmatpush3.msra.mxu1 %v547_v18  ;;  %v632_v1 = vld [vmem:[#allocation5 + $0x100] sm:$0xff] }
  0x77   :  { %967 = vmatprep.subr.mxu0 %v1129_v11  ;;  %1002 = vmatprep.subr.mxu1 %v1129_v11 }
  0x78   :  { %968 = vmatpush3.msra.mxu0 %v455_v2  ;;  %1003 = vmatpush3.msra.mxu1 %v546_v19  ;;  %v559_v2 = vsub.s32 2, %v1238_v24 }
  0x79   :  { %969 = vmatprep.subr.mxu0 %v1129_v11  ;;  %1004 = vmatprep.subr.mxu1 %v1129_v11 }
  0x7a   :  { %970 = vmatpush3.msra.mxu0 %v454_v3  ;;  %1005 = vmatpush3.msra.mxu1 %v545_v20  ;;  %v560_v3 = vrot.slane %v1244_v27, %v559_v2 }
  0x7b   :  { %971 = vmatprep.subr.mxu0 %v1129_v11  ;;  %1006 = vmatprep.subr.mxu1 %v1129_v11 }
  0x7c   :  { %972 = vmatpush3.msra.mxu0 %v453_v4  ;;  %1007 = vmatpush3.msra.mxu1 %v544_v21 }
  0x7d   :  { %973 = vmatprep.subr.mxu0 %v1129_v11  ;;  %1008 = vmatprep.subr.mxu1 %v1129_v11 }
  0x7e   :  { %974 = vmatpush3.msra.mxu0 %v452_v5  ;;  %1009 = vmatpush3.msra.mxu1 %v543_v22 }
  0x7f   :  { %975 = vmatprep.subr.mxu0 %v1129_v11  ;;  %1010 = vmatprep.subr.mxu1 %v1129_v11 }
  0x80   :  { %976 = vmatpush3.msra.mxu0 %v451_v6  ;;  %1011 = vmatpush3.msra.mxu1 %v542_v43 }
  0x81   :  { %977 = vmatprep.subr.mxu0 %v1129_v11  ;;  %1012 = vmatprep.subr.mxu1 %v1129_v11 }
  0x82   :  { %978 = vmatpush3.msra.mxu0 %v450_v7  ;;  %1013 = vmatpush3.msra.mxu1 %v541_v44  ;;  %v650_v7 = vsub.s32 3, %v1238_v24 }
  0x83   :  { %1017 = vmatprep.subr.mxu0 %v1129_v11 }
  0x84   :  { %v651_v8 = vrot.slane %v1244_v27, %v650_v7 }
  0xfd   :  { %v771_v25 = vpop.f32.mrf.mxu0 }
  0xff   :  { %v772_v28 = vpop.f32.mrf.mxu0 }
 0x100   :  { %v806_v29 = vpop.f32.mrf.mxu1  ;;  %v773_v31 = vadd.f32 %v772_v28, %v771_v25 }
 0x102   :  { %v807_v32 = vpop.f32.mrf.mxu1  ;;  %v237_v33 = vadd.f32 %v773_v31, %v169_v30 }
 0x103   :  { %v808_v34 = vadd.f32 %v807_v32, %v806_v29 }
 0x105   :  { %v307_v37 = vadd.f32 %v808_v34, %v237_v33 }
 0x11f   :  { %v841_v35 = vpop.f32.mrf.mxu0 }
 0x121   :  { %v842_v36 = vpop.f32.mrf.mxu0 }
 0x122   :  { %v843_v38 = vadd.f32 %v842_v36, %v841_v35  ;;  %v446_v39 = vpop.f32.mrf.mxu1 }
 0x124   :  { %v377_v40 = vadd.f32 %v843_v38, %v307_v37  ;;  %v946_v41 = vpop.f32.mrf.mxu1 }
 0x126   :  { %v447_v42 = vadd.f32 %v446_v39, %v377_v40 }
 0x128   :  { %980 = vmatmul.mubr.f32.vlgmr.msra.gmra.mxu0 %v447_v42 }
 0x129   :  { %1049 = vmatprep.mubr.msk.f32.mxu0 %vm1130_vm0, %v1129_v11  ;;  %1018 = vmatpush3.msra.mxu0 %v647_v45 }
 0x12a   :  { %1019 = vmatprep.subr.mxu0 %v1129_v11 }
 0x12b   :  { %1020 = vmatpush3.msra.mxu0 %v646_v46 }
 0x12c   :  { %1021 = vmatprep.subr.mxu0 %v1129_v11 }
 0x12d   :  { %1022 = vmatpush3.msra.mxu0 %v645_v47 }
 0x12e   :  { %1023 = vmatprep.subr.mxu0 %v1129_v11 }
 0x12f   :  { %1024 = vmatpush3.msra.mxu0 %v644_v48 }
 0x130   :  { %1025 = vmatprep.subr.mxu0 %v1129_v11 }
 0x131   :  { %1026 = vmatpush3.msra.mxu0 %v643_v49 }
 0x132   :  { %1027 = vmatprep.subr.mxu0 %v1129_v11 }
 0x133   :  { %1028 = vmatpush3.msra.mxu0 %v642_v50 }
 0x134   :  { %1029 = vmatprep.subr.mxu0 %v1129_v11 }
 0x135   :  { %1030 = vmatpush3.msra.mxu0 %v641_v51 }
 0x136   :  { %1031 = vmatprep.subr.mxu0 %v1129_v11 }
 0x137   :  { %1032 = vmatpush3.msra.mxu0 %v640_v52 }
 0x138   :  { %1033 = vmatprep.subr.mxu0 %v1129_v11 }
 0x139   :  { %1034 = vmatpush3.msra.mxu0 %v639_v53 }
 0x13a   :  { %1035 = vmatprep.subr.mxu0 %v1129_v11 }
 0x13b   :  { %1036 = vmatpush3.msra.mxu0 %v638_v54 }
 0x13c   :  { %1037 = vmatprep.subr.mxu0 %v1129_v11 }
 0x13d   :  { %1038 = vmatpush3.msra.mxu0 %v637_v55 }
 0x13e   :  { %1039 = vmatprep.subr.mxu0 %v1129_v11 }
 0x13f   :  { %1040 = vmatpush3.msra.mxu0 %v636_v56 }
 0x140   :  { %1041 = vmatprep.subr.mxu0 %v1129_v11 }
 0x141   :  { %1042 = vmatpush3.msra.mxu0 %v635_v57 }
 0x142   :  { %1043 = vmatprep.subr.mxu0 %v1129_v11 }
 0x143   :  { %1044 = vmatpush3.msra.mxu0 %v634_v58 }
 0x144   :  { %1045 = vmatprep.subr.mxu0 %v1129_v11 }
 0x145   :  { %1046 = vmatpush3.msra.mxu0 %v633_v0 }
 0x146   :  { %1047 = vmatprep.subr.mxu0 %v1129_v11 }
 0x147   :  { %1048 = vmatpush3.msra.mxu0 %v632_v1 }
 0x1e8   :  { %v536_v61 = vpop.f32.mrf.mxu0 }
 0x1e9   :  { %v537_v62 = vadd.f32 %v536_v61, %v469_v60 }
 0x1ea   :  { %v981_v63 = vpop.f32.mrf.mxu0 }
 0x1eb   :  { %1015 = vmatmul.mubr.f32.vlgmr.msra.gmra.mxu1 %v537_v62 }
 0x2ab   :  { %v627_v4 = vpop.f32.mrf.mxu1 }
 0x2ac   :  { %v628_v5 = vadd.f32 %v627_v4, %v560_v3 }
 0x2ad   :  { %v1016_v6 = vpop.f32.mrf.mxu1 }
 0x2ae   :  { %1050 = vmatmul.mubr.f32.vlgmr.msra.gmra.mxu0 %v628_v5 }
 0x36e   :  { %v718_v9 = vpop.f32.mrf.mxu0 }
 0x36f   :  { %v719_v10 = vadd.f32 %v718_v9, %v651_v8 }
 0x370   :  { %v1051_v11 = vpop.f32.mrf.mxu0 }
 0x371   :  { %722 = vst [vmem:[#allocation7] sm:$0xff] %v719_v10 }
 0x372   :  { %1110 = shalt.err (!%p1107_p0)
}
 0x373   :  { %732 = dma.vmem_to_hbm [thread:$0]  %s730_s14, 128, %s1278_s4, [#allocation4]  }
 0x374   :  { %1123 = dma.done.wait [#allocation4], 128  }
 0x375   :  { %1124 = vsyncadd [#allocation4], 4294967168 }
 0x376   :  { %736 = vsyncpa [#allocation3], 1 }
 0x377   :  { %737 = vsyncpa [#allocation6], 1 }
 0x378   :  { %738 = vsyncpa [#allocation4], 1 }

</bundles_post_ra>
